<compile_context>
chip_gen: v7x
topology: tpu7x:2x2x1
jax: 0.10.0
libtpu: 0.0.40
codegen_flags: <defaults>
</compile_context>

<pallas_src>
import functools

import jax
import jax.numpy as jnp
import numpy as np
from jax.experimental import pallas as pl
from jax.experimental.pallas import tpu as pltpu


def _sigmoid(z):
    return 1.0 / (1.0 + jnp.exp(-z))


# ----------------------------------------------------------------------------- kernel
def _prob_block_kernel(gx_ref, wgx_ref, bgx_ref, wm_ref, bm_ref, o_ref, *, F_g):
    # gx_ref  : (1, F_g+F_l, HW)  stacked [g; x] slab for this batch element
    # wgx_ref : (F_int, F_g+F_l)  BN-folded [W_g | W_x]
    # bgx_ref : (F_int, 1)        combined folded bias (conv biases + both BNs)
    # wm_ref  : (1, F_int)        BN-folded psi_m weights
    # bm_ref  : (1, 1)            folded psi_m bias
    # o_ref   : (1, F_l, HW)
    gx = gx_ref[0]                                                   # (F_g+F_l, HW)

    # W_g(g) + W_x(x) with both BNs folded in -> single MXU matmul, then ReLU.
    psi = jnp.dot(wgx_ref[...], gx, preferred_element_type=jnp.float32)
    psi = jnp.maximum(psi + bgx_ref[...], 0.0)                       # (F_int, HW)

    # psi_m (1x1 conv to 1 channel) + BN, then sigmoid.
    m = jnp.dot(wm_ref[...], psi, preferred_element_type=jnp.float32)
    a = _sigmoid(m + bm_ref[...])                                    # (1, HW)

    # Gate x (bottom F_l rows of the stacked slab) by the attention map.
    x_slab = gx[F_g:, :]                                             # (F_l, HW)
    o_ref[0] = (x_slab * a).astype(o_ref.dtype)


# ----------------------------------------------------------------------------- wrapper
def prob_block_al_forward(g, x,
                          Wg, bg, gam_g, bet_g, rm_g, rv_g,
                          Wx, bx, gam_x, bet_x, rm_x, rv_x,
                          Wm, bm, gam_m, bet_m, rm_m, rv_m,
                          eps=1e-5):
    """g: (N, F_g, H, W), x: (N, F_l, H, W) float32 NCHW.  Returns (N, F_l, H, W)."""
    N, F_g, H, W = g.shape
    _, F_l, _, _ = x.shape
    F_int = Wg.shape[0]
    HW = H * W
    Cgl = F_g + F_l

    # Fold conv bias + inference BatchNorm into per-channel (weight, bias).
    def fold(Wc, bc, gam, bet, rm, rv):
        s = gam / jnp.sqrt(rv + eps)              # (Co,)
        return s[:, None] * Wc, bet + s * (bc - rm)

    Wg_f, bg_f = fold(Wg, bg, gam_g, bet_g, rm_g, rv_g)
    Wx_f, bx_f = fold(Wx, bx, gam_x, bet_x, rm_x, rv_x)
    Wm_f, bm_f = fold(Wm, bm, gam_m, bet_m, rm_m, rv_m)

    W_gx = jnp.concatenate([Wg_f, Wx_f], axis=1)                     # (F_int, F_g+F_l)
    b_gx = (bg_f + bx_f)[:, None]                                    # (F_int, 1)
    b_m = bm_f.reshape(1, 1)                                         # (1, 1)

    # Stack g and x on the channel (sublane) axis; spatial (lane) axis = H*W.
    gx = jnp.concatenate([g.reshape(N, F_g, HW),
                          x.reshape(N, F_l, HW)], axis=1)            # (N, Cgl, HW)

    kernel = functools.partial(_prob_block_kernel, F_g=F_g)

    out = pl.pallas_call(
        kernel,
        out_shape=jax.ShapeDtypeStruct((N, F_l, HW), jnp.float32),
        grid_spec=pltpu.PrefetchScalarGridSpec(
            num_scalar_prefetch=0,
            grid=(N,),
            in_specs=[
                pl.BlockSpec((1, Cgl, HW), lambda n: (n, 0, 0)),
                pl.BlockSpec((F_int, Cgl), lambda n: (0, 0)),
                pl.BlockSpec((F_int, 1), lambda n: (0, 0)),
                pl.BlockSpec((1, F_int), lambda n: (0, 0)),
                pl.BlockSpec((1, 1), lambda n: (0, 0)),
            ],
            out_specs=pl.BlockSpec((1, F_l, HW), lambda n: (n, 0, 0)),
        ),
        compiler_params=pltpu.CompilerParams(
            dimension_semantics=("parallel",)),
    )(gx, W_gx, b_gx, Wm_f, b_m)

    return out.reshape(N, F_l, H, W)


# ----------------------------------------------------------------------------- reference
def prob_block_al_reference(g, x,
                            Wg, bg, gam_g, bet_g, rm_g, rv_g,
                            Wx, bx, gam_x, bet_x, rm_x, rv_x,
                            Wm, bm, gam_m, bet_m, rm_m, rv_m,
                            eps=1e-5):
    def conv1x1_bn(t, Wc, bc, gam, bet, rm, rv):
        y = jnp.einsum('nchw,oc->nohw', t, Wc) + bc[None, :, None, None]
        y = (y - rm[None, :, None, None]) / jnp.sqrt(rv + eps)[None, :, None, None]
        return y * gam[None, :, None, None] + bet[None, :, None, None]

    g1 = conv1x1_bn(g, Wg, bg, gam_g, bet_g, rm_g, rv_g)
    x1 = conv1x1_bn(x, Wx, bx, gam_x, bet_x, rm_x, rv_x)
    psi = jnp.maximum(g1 + x1, 0.0)
    psi = conv1x1_bn(psi, Wm, bm, gam_m, bet_m, rm_m, rv_m)
    psi = _sigmoid(psi)
    return x * psi


# ----------------------------------------------------------------------------- main
if __name__ == "__main__":
    N, F_g, F_l, F_int, H, W = 2, 4, 4, 16, 16, 16
    eps = 1e-5

    key = jax.random.PRNGKey(0)
    ks = jax.random.split(key, 24)

    g = jax.random.normal(ks[0], (N, F_g, H, W), jnp.float32)
    x = jax.random.normal(ks[1], (N, F_l, H, W), jnp.float32)

    def mk_params(kbase, Ci, Co):
        Wc = 0.3 * jax.random.normal(ks[kbase + 0], (Co, Ci), jnp.float32)
        bc = 0.1 * jax.random.normal(ks[kbase + 1], (Co,), jnp.float32)
        gam = 0.5 + jax.random.uniform(ks[kbase + 2], (Co,), jnp.float32)
        bet = 0.1 * jax.random.normal(ks[kbase + 3], (Co,), jnp.float32)
        rm = 0.1 * jax.random.normal(ks[kbase + 4], (Co,), jnp.float32)
        rv = 0.5 + jax.random.uniform(ks[kbase + 5], (Co,), jnp.float32)
        return Wc, bc, gam, bet, rm, rv

    Wg, bg, gam_g, bet_g, rm_g, rv_g = mk_params(2, F_g, F_int)
    Wx, bx, gam_x, bet_x, rm_x, rv_x = mk_params(8, F_l, F_int)
    Wm, bm, gam_m, bet_m, rm_m, rv_m = mk_params(14, F_int, 1)

    out = prob_block_al_forward(g, x,
                                Wg, bg, gam_g, bet_g, rm_g, rv_g,
                                Wx, bx, gam_x, bet_x, rm_x, rv_x,
                                Wm, bm, gam_m, bet_m, rm_m, rv_m, eps)
    out = jax.block_until_ready(out)

    ref = prob_block_al_reference(g, x,
                                  Wg, bg, gam_g, bet_g, rm_g, rv_g,
                                  Wx, bx, gam_x, bet_x, rm_x, rv_x,
                                  Wm, bm, gam_m, bet_m, rm_m, rv_m, eps)
    np.testing.assert_allclose(np.asarray(out), np.asarray(ref),
                               rtol=1e-4, atol=1e-4)

    print("KERNEL_OK")
</pallas_src>

<mosaic_0001>
module attributes {stable_mosaic.version = 11 : i64} {
  func.func @_prob_block_kernel(%arg0: i32, %arg1: memref<1x8x256xf32, #tpu.memory_space<vmem>>, %arg2: memref<16x8xf32, #tpu.memory_space<vmem>>, %arg3: memref<16x1xf32, #tpu.memory_space<vmem>>, %arg4: memref<1x16xf32, #tpu.memory_space<vmem>>, %arg5: memref<1x1xf32, #tpu.memory_space<vmem>>, %arg6: memref<1x4x256xf32, #tpu.memory_space<vmem>>) attributes {dimension_semantics = [#tpu.dimension_semantics<parallel>], iteration_bounds = array<i64: 2>, scalar_prefetch = 0 : i64, scratch_operands = 0 : i64, tpu.core_type = #tpu.core_type<tc>, window_params = [{transform_indices = @transform_0, window_bounds = array<i64: 1, 8, 256>}, {pipeline_mode = #tpu.pipeline_mode<synchronous>, transform_indices = @transform_1, window_bounds = array<i64: 16, 8>}, {pipeline_mode = #tpu.pipeline_mode<synchronous>, transform_indices = @transform_2, window_bounds = array<i64: 16, 1>}, {pipeline_mode = #tpu.pipeline_mode<synchronous>, transform_indices = @transform_3, window_bounds = array<i64: 1, 16>}, {pipeline_mode = #tpu.pipeline_mode<synchronous>, transform_indices = @transform_4, window_bounds = array<i64: 1, 1>}, {transform_indices = @transform_5, window_bounds = array<i64: 1, 4, 256>}]} {
    %c0 = arith.constant 0 : index
    %c0_0 = arith.constant 0 : index
    %c0_1 = arith.constant 0 : index
    %0 = vector.load %arg1[%c0, %c0_0, %c0_1] : memref<1x8x256xf32, #tpu.memory_space<vmem>>, vector<1x8x256xf32>
    %1 = vector.shape_cast %0 : vector<1x8x256xf32> to vector<8x256xf32>
    %c0_2 = arith.constant 0 : index
    %c0_3 = arith.constant 0 : index
    %2 = vector.load %arg2[%c0_2, %c0_3] : memref<16x8xf32, #tpu.memory_space<vmem>>, vector<16x8xf32>
    %cst = arith.constant dense<0.000000e+00> : vector<16x256xf32>
    %3 = tpu.matmul %2, %1, %cst {dimension_numbers = #tpu.dot_dimension_numbers<[1], [0], [0], [1], [0, 0, 1, 1], [], []>} : vector<16x8xf32>, vector<8x256xf32>, vector<16x256xf32> -> vector<16x256xf32>
    %c0_4 = arith.constant 0 : index
    %c0_5 = arith.constant 0 : index
    %4 = vector.load %arg3[%c0_4, %c0_5] : memref<16x1xf32, #tpu.memory_space<vmem>>, vector<16x1xf32>
    %5 = vector.broadcast %4 : vector<16x1xf32> to vector<16x256xf32>
    %6 = arith.addf %3, %5 : vector<16x256xf32>
    %cst_6 = arith.constant 0.000000e+00 : f32
    %7 = vector.broadcast %cst_6 : f32 to vector<16x256xf32>
    %8 = arith.maximumf %6, %7 : vector<16x256xf32>
    %c0_7 = arith.constant 0 : index
    %c0_8 = arith.constant 0 : index
    %9 = vector.load %arg4[%c0_7, %c0_8] : memref<1x16xf32, #tpu.memory_space<vmem>>, vector<1x16xf32>
    %cst_9 = arith.constant dense<0.000000e+00> : vector<1x256xf32>
    %10 = tpu.matmul %9, %8, %cst_9 {dimension_numbers = #tpu.dot_dimension_numbers<[1], [0], [0], [1], [0, 0, 1, 1], [], []>} : vector<1x16xf32>, vector<16x256xf32>, vector<1x256xf32> -> vector<1x256xf32>
    %c0_10 = arith.constant 0 : index
    %c0_11 = arith.constant 0 : index
    %11 = vector.load %arg5[%c0_10, %c0_11] : memref<1x1xf32, #tpu.memory_space<vmem>>, vector<1x1xf32>
    %12 = vector.broadcast %11 : vector<1x1xf32> to vector<1x256xf32>
    %13 = arith.addf %10, %12 : vector<1x256xf32>
    %cst_12 = arith.constant 0.000000e+00 : f32
    %14 = vector.broadcast %cst_12 : f32 to vector<1x256xf32>
    %15 = arith.subf %14, %13 : vector<1x256xf32>
    %16 = math.exp %15 : vector<1x256xf32>
    %cst_13 = arith.constant 1.000000e+00 : f32
    %17 = vector.broadcast %cst_13 : f32 to vector<1x256xf32>
    %18 = arith.addf %17, %16 : vector<1x256xf32>
    %cst_14 = arith.constant 1.000000e+00 : f32
    %19 = vector.broadcast %cst_14 : f32 to vector<1x256xf32>
    %20 = arith.divf %19, %18 : vector<1x256xf32>
    %21 = vector.extract_strided_slice %1 {offsets = [4, 0], sizes = [4, 256], strides = [1, 1]} : vector<8x256xf32> to vector<4x256xf32>
    %22 = vector.broadcast %20 : vector<1x256xf32> to vector<4x256xf32>
    %23 = arith.mulf %21, %22 : vector<4x256xf32>
    %c0_15 = arith.constant 0 : index
    %c0_16 = arith.constant 0 : index
    %c0_17 = arith.constant 0 : index
    %24 = vector.load %arg6[%c0_15, %c0_16, %c0_17] : memref<1x4x256xf32, #tpu.memory_space<vmem>>, vector<1x4x256xf32>
    %25 = vector.shape_cast %24 : vector<1x4x256xf32> to vector<4x256xf32>
    %26 = vector.shape_cast %23 : vector<4x256xf32> to vector<1x4x256xf32>
    tpu.vector_store %arg6[%c0_15, %c0_16, %c0_17], %26 {strides = array<i32>} : memref<1x4x256xf32, #tpu.memory_space<vmem>>, vector<1x4x256xf32>,
    return
  }
  func.func @transform_0(%arg0: i32) -> (i32, i32, i32) {
    %c0_i32 = arith.constant 0 : i32
    %c0_i32_0 = arith.constant 0 : i32
    %c0_i32_1 = arith.constant 0 : i32
    return %arg0, %c0_i32, %c0_i32_0 : i32, i32, i32
  }
  func.func @transform_1(%arg0: i32) -> (i32, i32) {
    %c0_i32 = arith.constant 0 : i32
    %c0_i32_0 = arith.constant 0 : i32
    %c0_i32_1 = arith.constant 0 : i32
    return %c0_i32, %c0_i32_0 : i32, i32
  }
  func.func @transform_2(%arg0: i32) -> (i32, i32) {
    %c0_i32 = arith.constant 0 : i32
    %c0_i32_0 = arith.constant 0 : i32
    %c0_i32_1 = arith.constant 0 : i32
    return %c0_i32, %c0_i32_0 : i32, i32
  }
  func.func @transform_3(%arg0: i32) -> (i32, i32) {
    %c0_i32 = arith.constant 0 : i32
    %c0_i32_0 = arith.constant 0 : i32
    %c0_i32_1 = arith.constant 0 : i32
    return %c0_i32, %c0_i32_0 : i32, i32
  }
  func.func @transform_4(%arg0: i32) -> (i32, i32) {
    %c0_i32 = arith.constant 0 : i32
    %c0_i32_0 = arith.constant 0 : i32
    %c0_i32_1 = arith.constant 0 : i32
    return %c0_i32, %c0_i32_0 : i32, i32
  }
  func.func @transform_5(%arg0: i32) -> (i32, i32, i32) {
    %c0_i32 = arith.constant 0 : i32
    %c0_i32_0 = arith.constant 0 : i32
    %c0_i32_1 = arith.constant 0 : i32
    return %arg0, %c0_i32, %c0_i32_0 : i32, i32, i32
  }
}

</mosaic_0001>

<bundles_post_ra>
// kernel: tpu_custom_call.1
= control target key start
LH: loop header
LB: loop body
LE: loop exit
PB: predicated region body
PF: predicated region fallthrough
CT: control target
= control target key end

     0   :  { %s807_s0 = inlined_call_operand.vmem [shape: f32[2,8,256], index: 0, kind: input, shape index: {}]   ;;  %s808_s1 = inlined_call_operand.vmem [shape: f32[16,8], index: 1, kind: input, shape index: {}]   ;;  %s809_s2 = inlined_call_operand.vmem [shape: f32[16,1], index: 2, kind: input, shape index: {}]   ;;  %s810_s3 = inlined_call_operand.vmem [shape: f32[1,16], index: 3, kind: input, shape index: {}]   ;;  %s811_s4 = inlined_call_operand.<no memory space> [shape: f32[1,1], index: 4, kind: input, shape index: {}]   ;;  %s812_s5 = inlined_call_operand.hbm [shape: f32[2,4,256], index: 5, kind: output, shape index: {}]  }
   0x1   :  { %v10_v0 = vstv %s811_s4 }
   0x2   :  { %11 = vst [vmem:[#allocation2] sm:$0x1] %v10_v0 }
   0x3   :  { %12 = vsyncpa [#allocation4], 0 }
   0x4   :  { %14 = vsyncpa [#allocation4 + $0x1], 0  ;;  %s688_s20 = smov 0   ;;  %s690_s21 = smov 0  }
   0x5   :  { %s692_s22 = smov 0   ;;  %s694_s23 = smov 0  }
   0x6 LB: > { %s709_s4 = sadd.s32 4294967295, %s650_s23   ;;  %s516_s24 = sadd.s32 4294967294, %s650_s23   ;;  %s650_s23 = sphi %s694_s23, %s818_s23   ;;  %s646_s22 = sphi %s692_s22, %s817_s22   ;;  %s642_s21 = sphi %s690_s21, %s816_s21   ;;  %s638_s20 = sphi %s688_s20, %s815_s20  }
   0x7   : > { %s713_s25 = sadd.s32 1, %s650_s23   ;;  %s137_s26 = sadd.s32 1, %s646_s22 }
   0x8   : > { %s134_s27 = ssub.s32 %s650_s23, %s713_s25  ;;  %p147_p0 = scmp.ne.s32.totalorder %s646_s22, %s642_s21 }
   0x9   : > { %p135_p1 = scmp.eq.s32.totalorder %s134_s27, 0  ;;  %p148_p2 = scmp.eq.s32.totalorder %s709_s4, 1 }
   0xa   : > { %p153_p3 = scmp.ne.s32.totalorder %s642_s21, %s638_s20  ;;  %p154_p4 = scmp.eq.s32.totalorder %s516_s24, 1 }
   0xb   : > { %s724_s28 = scalar_select %p135_p1, %s646_s22, %s137_s26  }
   0xc   : > { %p726_p5 = por %p148_p2, %p147_p0  ;;  %p730_p6 = por %p154_p4, %p153_p3 }
   0xd   : > { %p519_p7 = scmp.ge.s32.totalorder %s650_s23, 1  ;;  %p192_p8 = scmp.lt.s32.totalorder %s650_s23, 3 }
   0xf   : > { %p193_p9 = pnand %p519_p7, %p192_p8 }
  0x10   : > { %p220_p10 = scmp.lt.s32.totalorder (!%p193_p9), %s709_s4, 1  ;;  %v652_v1 = vmov (!%p193_p9), 0.0   ;;  %v653_v2 = vmov (!%p193_p9), 0   ;;  %v229_v3 = vld [vmem:[%s809_s2] sm:$0xff] (!%p193_p9)  ;;  %v230_v4 = vld [vmem:[%s809_s2 + $0x8] sm:$0xff] (!%p193_p9)  ;;  %vm241_vm0 = vcmask (!%p193_p9), 64512   ;;  %v336_v27 = vlaneseq (!%p193_p9) }
  0x11   : > { %196 = sbr.rel (%p193_p9) target bundleno = 521 (0x209), region = 40  ;;  %312 = vmatprep.mubr.f32.mxu0 (!%p193_p9), %v652_v1  ;;  %578 = vset.pattern.permute.xlu0 (!%p193_p9), %v653_v2  ;;  %v227_v7 = vld [vmem:[%s808_s1] sm:$0xff] (!%p193_p9)  ;;  %v228_v8 = vld [vmem:[%s808_s1 + $0x8] sm:$0xff] (!%p193_p9)  ;;  %vm340_vm1 = vcmask (!%p193_p9), 130048   ;;  %s217_s26 = sand.u32 (!%p193_p9), 1, %s642_s21  }
  0x12   : > { %233 = vperm.xlu0 (!%p193_p9), %578, %v229_v3   ;;  %408 = vmatprep.mubr.f32.mxu1 (!%p193_p9), %v652_v1  ;;  %v330_v9 = vld [vmem:[#allocation2] sm:$0x1] (!%p193_p9)  ;;  %v337_v28 = vshrl.u32 (!%p193_p9), %v336_v27, 7  ;;  %s520_s27 = sshll.u32 (!%p193_p9), %s217_s26, 3  ;;  %s532_s6 = sshll.u32 (!%p193_p9), %s709_s4, 7 }
  0x13   : > { %579 = vset.pattern.permute.xlu1 (!%p193_p9), %v653_v2  ;;  %v329_v26 = vld [vmem:[%s810_s3] sm:$0x1] (!%p193_p9)  ;;  %s219_s7 = scalar_lea.vmem (!%p193_p9), [#allocation3], %s520_s27  ;;  %s443_s12 = scalar_lea.sflag (!%p193_p9), [#allocation4], %s217_s26 }
  0x14   : > { %333 = vperm.xlu1 (!%p193_p9), %579, %v330_v9   ;;  %v338_v29 = vsub.s32 (!%p193_p9), 0, %v337_v28 }
  0x16   : > { %238 = vperm.xlu0 (!%p193_p9), %578, %v230_v4  }
  0x18   : > { %s221_s8 = scalar_select %p220_p10, %s709_s4, 1 }
  0x19   : > { %s654_s4 = smov [#allocation3]  }
  0x1a   : > { %s531_s11 = sshll.u32 %s221_s8, 4  ;;  %s457_s8 = sshll.u32 %s219_s7, 4  ;;  %s767_s8 = int_to_ptr.vmem [resolvable:$true] %s457_s8 }
  0x1b   : > { %s224_s14 = scalar_lea.vmem %s807_s0, %s531_s11  ;;  %s765_s11 = scalar_lea.hbm %s812_s5, %s532_s6 }
  0x1c   : > { %v747_v5 = vld [vmem:[%s224_s14 + $0x8] sm:$0xff]  ;;  %v225_v6 = vld [vmem:[%s224_s14] sm:$0xff]  ;;  %s588_s13 = scalar_lea.vmem %s767_s8, 128  ;;  %s592_s14 = sshll.u32 %s654_s4, 4  ;;  %s593_s14 = int_to_ptr.vmem [resolvable:$false] %s592_s14 }
  0x1d   : > { %248 = vmatprep.subr.mxu0 %v747_v5  ;;  %p589_p11 = scmp.ne.s32.totalorder %s767_s8, %s588_s13  ;;  %s594_s15 = scalar_lea.vmem %s593_s14, 256 }
  0x1e   : > { %249 = vmatpush1.msra.mxu0 %v225_v6  ;;  %p595_p0 = scmp.lt.s32.totalorder %s767_s8, %s593_s14  ;;  %p596_p1 = scmp.lt.s32.totalorder %s594_s15, %s588_s13 }
  0x1f   : > { %523 = vmatmul.mubr.msk.f32.vlgmr.msra.gmra.mrb[0].mxu0 %vm241_vm0, %v227_v7  ;;  %p590_p12 = pnand %p589_p11, %p726_p5 }
  0x20   : > { %318 = vmatprep.mubr.f32.mxu0 %v652_v1  ;;  %p597_p2 = por %p596_p1, %p595_p0 }
  0x21   : > { %p591_p13 = pneg %p590_p12 }
  0x23   : > { %524 = vmatmul.mubr.msk.f32.gmra.mrb[2].mxu0 %vm241_vm0, %v228_v8  ;;  %p598_p3 = pnand %p597_p2, %p591_p13 }
  0x91   : > { %v234_v10 = vpop.permute.xlu0 %233 }
  0x93   : > { %v334_v30 = vpop.permute.xlu1 %333 }
  0x94   : > { %v339_v31 = vrot.slane %v334_v30, %v338_v29 }
  0x95   : > { %v239_v14 = vpop.permute.xlu0 %238 }
  0xf2   : > { %v314_v11 = vpop.f32.mrb[0].mxu0 }
  0xf3   : > { %v316_v12 = vpop.f32.mrb[1].mxu0  ;;  %v315_v13 = vadd.f32 %v314_v11, %v234_v10 }
  0xf4   : > { %v317_v15 = vadd.f32 %v316_v12, %v234_v10 }
  0xf5   : > { %v325_v20 = vmax.f32 %v315_v13, 0.0 }
  0xf6   : > { %v320_v16 = vpop.f32.mrb[2].mxu0  ;;  %v326_v22 = vmax.f32 %v317_v15, 0.0 }
  0xf7   : > { %v321_v17 = vadd.f32 %v320_v16, %v239_v14  ;;  %v322_v18 = vpop.f32.mrb[3].mxu0 }
  0xf8   : > { %v323_v19 = vadd.f32 %v322_v18, %v239_v14 }
  0xf9   : > { %v327_v21 = vmax.f32 %v321_v17, 0.0 }
  0xfa   : > { %v328_v23 = vmax.f32 %v323_v19, 0.0 }
  0xfb   : > { %v535_v24 = vpack.c.bf16 %v327_v21, %v325_v20 }
  0xfc   : > { %v533_v25 = vpack.c.bf16 %v328_v23, %v326_v22 }
  0xfe   : > { %534 = vmatprep.subr.bf16.mxu1 %v533_v25 }
  0xff   : > { %536 = vmatpush1.bf16.msra.mxu1 %v535_v24 }
 0x102   : > { %525 = vmatmul.mubr.msk.f32.vlgmr.msra.gmra.mrb[0].mxu1 %vm340_vm1, %v329_v26 }
 0x1d5   : > { %v410_v32 = vpop.f32.mrb[0].mxu1 }
 0x1d6   : > { %v411_v33 = vadd.f32 %v410_v32, %v339_v31  ;;  %v412_v34 = vpop.f32.mrb[1].mxu1 }
 0x1d7   : > { %v413_v35 = vadd.f32 %v412_v34, %v339_v31 }
 0x1d8   : > { %v415_v36 = vsub.f32 0.0, %v411_v33 }
 0x1d9   : > { %v416_v37 = vsub.f32 0.0, %v413_v35 }
 0x1da   : > { %v417_v38 = vmul.f32 1.442695, %v415_v36 }
 0x1db   : > { %v419_v39 = vmul.f32 1.442695, %v416_v37 }
 0x1dc   : > { %580 = vpow2.f32 %v417_v38 }
 0x1dd   : > { %582 = vpow2.f32 %v419_v39 }
 0x1e6   : > { %v581_v40 = vpop.eup %580 }
 0x1e7   : > { %v583_v41 = vpop.eup %582  ;;  %v421_v42 = vadd.f32 1.0, %v581_v40 }
 0x1e8   : > { %v422_v43 = vadd.f32 1.0, %v583_v41 }
 0x1e9   : > { %584 = vrcp.f32 %v421_v42 }
 0x1ea   : > { %586 = vrcp.f32 %v422_v43 }
 0x1f3   : > { %v585_v44 = vpop.eup %584 }
 0x1f4   : > { %v587_v45 = vpop.eup %586  ;;  %v430_v46 = vrot.slane %v585_v44, %v338_v29 }
 0x1f5   : > { %v434_v47 = vrot.slane %v587_v45, %v338_v29 }
 0x1f6   : > { %v435_v48 = vmul.f32 %v430_v46, %v225_v6 }
 0x1f7   : > { %v436_v49 = vmul.f32 %v434_v47, %v747_v5 }
 0x1f9   : > { %v439_v50 = vcombine.high %v435_v48, %v436_v49 }
 0x1fb   : > { %441 = vst [vmem:[%s219_s7] sm:$0xff] %v439_v50 }
 0x1fc   : > { %601 = shalt.err (!%p598_p3)
}
 0x1fd   : > { %s602_s16 = scalar_lea.hbm %s765_s11, 128  ;;  %s606_s19 = scalar_lea.hbm %s812_s5, 256 }
 0x1fe   : > { %p603_p4 = scmp.ne.s32.totalorder %s765_s11, %s602_s16  ;;  %p607_p9 = scmp.lt.u32.totalorder %s765_s11, %s812_s5 }
 0x1ff   : > { %p608_p10 = scmp.lt.u32.totalorder %s606_s19, %s602_s16  ;;  %p610_p12 = scmp.lt.u32.totalorder %s602_s16, %s765_s11 }
 0x200   : > { %p604_p7 = pnand %p603_p4, %p726_p5 }
 0x201   : > { %p609_p11 = por %p608_p10, %p607_p9 }
 0x202   : > { %p605_p8 = pneg %p604_p7 }
 0x203   : > { %p611_p13 = por %p610_p12, %p609_p11 }
 0x205   : > { %p612_p0 = pnand %p611_p13, %p605_p8 }
 0x207   : > { %615 = shalt.err (!%p612_p0)
}
 0x208   : > { %537 = dma.vmem_to_hbm [thread:$0]  (%p726_p5), %s767_s8, 128, %s765_s11, %s443_s12  }
 0x209 PF: > { %p543_p1 = scmp.ge.s32.totalorder %s650_s23, 2  ;;  %s469_s27 = sand.u32 1, %s638_s20  }
 0x20a   : > { %s470_s6 = scalar_lea.sflag [#allocation4], %s469_s27 }
 0x20b   : > { %p540_p2 = pnand %p543_p1, %p730_p6 }
 0x20d   : > { %633 = dma.done.wait (!%p540_p2), %s470_s6, 128  }
 0x20e   : > { %635 = vsyncadd (!%p540_p2), %s470_s6, 4294967168  ;;  %p17_p3 = scmp.ge.s32.totalorder %s713_s25, 4   ;;  %s815_s20 = smov %s642_s21 }
 0x20f   : > { %s816_s21 = smov %s646_s22  ;;  %s817_s22 = smov %s724_s28 }
 0x210   : > { %s818_s23 = smov %s713_s25  ;;  %19 = sbr.rel (!%p17_p3) target bundleno = 6 (0x6), region = 75 }
 0x217   :  { %475 = vsyncpa [#allocation4], 1 }
 0x218   :  { %477 = vsyncpa [#allocation4 + $0x1], 1 }

</bundles_post_ra>
